<compile_context>
chip_gen: v7x
topology: tpu7x:2x2x1
jax: 0.10.0
libtpu: 0.0.40
codegen_flags: <defaults>
</compile_context>

<pallas_src>
import jax
import jax.numpy as jnp
from jax.experimental import pallas as pl
from jax.experimental.pallas import tpu as pltpu


def _identity_dma_kernel(x_hbm, o_hbm, sem):
    # One whole-array HBM->HBM DMA: start + wait.  No grid, no VMEM staging.
    cp = pltpu.make_async_copy(x_hbm, o_hbm, sem)
    cp.start()
    cp.wait()


def _identity_dma_copy(x):
    """Identity copy of `x` as a single HBM->HBM async DMA inside a kernel."""
    return pl.pallas_call(
        _identity_dma_kernel,
        out_shape=jax.ShapeDtypeStruct(x.shape, x.dtype),
        in_specs=[pl.BlockSpec(memory_space=pl.ANY)],   # leave input in HBM
        out_specs=pl.BlockSpec(memory_space=pl.ANY),    # write output in HBM
        scratch_shapes=[pltpu.SemaphoreType.DMA],       # single DMA semaphore
    )(x)


def small_model_forward(inputs, input_lengths=None, *, force_kernel=False):
    """Forward of the abstract SmallModel: identity pass-through.

    inputs:         (B, C, H, W) array (NCHW, matching the PyTorch convention).
    input_lengths:  unused (the abstract base defines no semantics for it).
    force_kernel:   if False (default) the kernel is elided entirely — the
                    highest-value optimization for a pure pass-through.  If
                    True, run the identity as one HBM->HBM DMA Pallas kernel.
    """
    del input_lengths  # no semantics defined by the abstract module
    if not force_kernel:
        return inputs
    return _identity_dma_copy(inputs)


if __name__ == "__main__":
    key = jax.random.PRNGKey(0)
    # Small NCHW input consistent with a conv-style model: batch=2, channels=4,
    # spatial 16x16.
    x = jax.random.normal(key, (2, 4, 16, 16), dtype=jnp.float32)

    # Default (optimal) path: fully elided identity.
    y_elided = small_model_forward(x)
    assert y_elided is x or bool(jnp.allclose(y_elided, x))

    # Kernel path (required for the exercise): single HBM->HBM DMA copy.
    y = small_model_forward(x, force_kernel=True)
    y = jax.block_until_ready(y)

    assert y.shape == x.shape and y.dtype == x.dtype
    assert bool(jnp.allclose(y, x))

    print("KERNEL_OK")
</pallas_src>

<mosaic_0001>
module attributes {stable_mosaic.version = 11 : i64} {
  func.func @_identity_dma_kernel(%arg0: memref<2x4x16x16xf32, #tpu.memory_space<any>>, %arg1: memref<2x4x16x16xf32, #tpu.memory_space<any>>, %arg2: memref<!tpu.dma_semaphore, #tpu.memory_space<semaphore_mem>>) attributes {dimension_semantics = [], scalar_prefetch = 0 : i64, scratch_operands = 1 : i64, tpu.core_type = #tpu.core_type<tc>} {
    tpu.enqueue_dma source(%arg0 : memref<2x4x16x16xf32, #tpu.memory_space<any>>) target(%arg1 : memref<2x4x16x16xf32, #tpu.memory_space<any>>) target_semaphore(%arg2 : memref<!tpu.dma_semaphore, #tpu.memory_space<semaphore_mem>>)
    tpu.wait_dma2 semaphore(%arg2 : memref<!tpu.dma_semaphore, #tpu.memory_space<semaphore_mem>>) src(%arg0 : memref<2x4x16x16xf32, #tpu.memory_space<any>>) dst(%arg1 : memref<2x4x16x16xf32, #tpu.memory_space<any>>)
    return
  }
}

</mosaic_0001>

<bundles_post_ra>
// kernel: tpu_custom_call.1
= control target key start
LH: loop header
LB: loop body
LE: loop exit
PB: predicated region body
PF: predicated region fallthrough
CT: control target
= control target key end

     0   :  { %s36_s6 = smov [#allocation2]   ;;  %s37_s7 = smov [#allocation3]   ;;  %s55_s0 = inlined_call_operand.hbm [shape: f32[2,4,16,16], index: 0, kind: input, shape index: {}]   ;;  %s56_s1 = inlined_call_operand.hbm [shape: f32[2,4,16,16], index: 1, kind: output, shape index: {}]  }
   0x1   :  { %s38_s8 = smov 0  }
   0x2   :  { %18 = dma.general %s55_s0, 2048, %s56_s1, %s36_s6, %s37_s7, [#allocation4], %s38_s8, 0  }
   0x3   :  { %34 = dma.done.wait [#allocation2], 2048 }
   0x4   :  { %35 = vsyncadd [#allocation2], 4294965248 }
   0x5   :  { %24 = vsyncmov [#allocation2] }
   0x8   :  { %s25_s13 = vpop.sfrf %24 }
   0x9   :  { %p30_p0 = scmp.ne.s32.totalorder %s25_s13, 0 }
   0xb   :  { %29 = shalt.err (%p30_p0)  }

</bundles_post_ra>
